<compile_context>
chip_gen: v5e
topology: v5e:2x2
jax: 0.10.0
libtpu: 0.0.40
codegen_flags: <defaults>
</compile_context>

<pallas_src>
import functools

import jax
import jax.numpy as jnp
from jax.experimental import pallas as pl
from jax.experimental.pallas import tpu as pltpu

_LANES = 128
_BLOCKED_WEIGHT_BUDGET = 4 * 1024 * 1024  # bytes: cap on P^2-replicated weights


def _ode_func_kernel(z_ref, w1_ref, b1_ref, w2_ref, b2_ref, out_ref, *,
                     backwards: bool, compute_dtype, elementwise_dtype):
    """out = sign * (tanh(z @ W1 + b1) @ W2 + b2), sign = +1 if backwards else -1."""
    z = z_ref[...].astype(compute_dtype)                    # in-kernel f32 -> bf16
    h = jnp.dot(z, w1_ref[...], preferred_element_type=jnp.float32)
    h = jnp.tanh(h.astype(elementwise_dtype) + b1_ref[...])  # bf16 on v6e/v7x, f32 on v5e
    g = jnp.dot(h.astype(w2_ref.dtype), w2_ref[...],
                preferred_element_type=jnp.float32)
    g = g + b2_ref[...]                                      # f32 final bias
    out_ref[...] = (g if backwards else -g).astype(out_ref.dtype)


def _block_diag(w, copies):
    """[a, b] -> [copies*a, copies*b] block-diagonal replication of w."""
    a, b = w.shape
    eye = jnp.eye(copies, dtype=w.dtype)
    return (eye[:, None, :, None] * w[None, :, None, :]).reshape(copies * a, copies * b)


def _round_up(x, m):
    return ((x + m - 1) // m) * m


def _pick_elementwise_dtype(compute_dtype):
    """bf16 elementwise only on chips with a bf16 VPU/EUP (v6e, v7x)."""
    try:
        kind = jax.devices()[0].device_kind.lower()
    except Exception:  # pragma: no cover - defensive
        kind = ""
    if ("v6" in kind) or ("v7" in kind) or ("7x" in kind):
        return compute_dtype
    return jnp.float32  # v5e and older: no bf16 VPU/EUP, keep f32 math


def reverse_graph_ode_func(z, params, t_local=None, backwards=False,
                           compute_dtype=jnp.bfloat16, row_tile=2048,
                           out_dtype=None, elementwise_dtype=None):
    """JAX wrapper mirroring ReverseGraphODEFunc.forward(t_local, z, backwards).

    z: [batch, n_nodes, latent] float32. t_local is unused by the reference
    forward (the wrapped net only sees z); accepted for signature parity.
    """
    del t_local
    w1, b1, w2, b2 = params
    B, N, D = z.shape
    H = w1.shape[1]
    M = B * N
    out_dtype = z.dtype if out_dtype is None else out_dtype
    if elementwise_dtype is None:
        elementwise_dtype = _pick_elementwise_dtype(compute_dtype)

    # Lane-dense packing: fold P = 128 // D consecutive rows into a single
    # 128-wide row (pure reinterpretation of the contiguous [M, D] buffer).
    P = _LANES // D if (D <= _LANES and _LANES % D == 0) else 1
    if P > 1:
        w_bytes = 2 * (P * D) * (P * H) * jnp.dtype(compute_dtype).itemsize
        if w_bytes > _BLOCKED_WEIGHT_BUDGET:
            P = 1  # P^2 weight replication would blow VMEM; lane-sparse fallback
    Dp, Hp = P * D, P * H

    w1b = _block_diag(w1, P).astype(compute_dtype)                    # [Dp, Hp]
    w2b = _block_diag(w2, P).astype(compute_dtype)                    # [Hp, Dp]
    b1b = jnp.tile(b1.reshape(1, H), (1, P)).astype(elementwise_dtype)  # [1, Hp]
    b2b = jnp.tile(b2.reshape(1, D), (1, P)).astype(jnp.float32)        # [1, Dp]

    # Pad original rows only to a multiple of 8*P (<= 8*P-1 zero rows), so the
    # packed row count M4 is a multiple of 8.  No padding to a tile multiple:
    # the ragged last grid block is masked by Pallas.
    Mp = _round_up(max(M, 1), 8 * P)
    M4 = Mp // P
    z2d = z.reshape(M, D)
    if Mp != M:
        z2d = jnp.pad(z2d, ((0, Mp - M), (0, 0)))
    zp = z2d.reshape(M4, Dp)                       # still f32; cast happens in-kernel

    # Row tile over packed rows (multiple of 8 sublanes).
    tm = min(row_tile, _round_up(max(M4, 8), 8))
    n_steps = -(-M4 // tm)
    if n_steps == 1 and M4 >= 16:
        # Ensure >=2 grid steps so both v7x TensorCores get work.
        tm = _round_up(-(-M4 // 2), 8)
        n_steps = -(-M4 // tm)

    kernel = functools.partial(_ode_func_kernel, backwards=bool(backwards),
                               compute_dtype=compute_dtype,
                               elementwise_dtype=elementwise_dtype)
    out_p = pl.pallas_call(
        kernel,
        out_shape=jax.ShapeDtypeStruct((M4, Dp), out_dtype),
        grid=(n_steps,),
        in_specs=[
            pl.BlockSpec((tm, Dp), lambda i: (i, 0)),   # z tile   (pipelined, f32)
            pl.BlockSpec((Dp, Hp), lambda i: (0, 0)),   # W1 block (resident)
            pl.BlockSpec((1, Hp), lambda i: (0, 0)),    # b1
            pl.BlockSpec((Hp, Dp), lambda i: (0, 0)),   # W2 block (resident)
            pl.BlockSpec((1, Dp), lambda i: (0, 0)),    # b2
        ],
        out_specs=pl.BlockSpec((tm, Dp), lambda i: (i, 0)),
        compiler_params=pltpu.CompilerParams(
            dimension_semantics=("parallel",),          # shard rows over v7x's 2 TCs
        ),
    )(zp, w1b, b1b, w2b, b2b)

    out = out_p.reshape(Mp, D)[:M]
    return out.reshape(B, N, D)


def init_ode_func_net_params(key, latent_dim, hidden_dim):
    """Deterministic synthetic params for Linear->tanh->Linear ode_func_net."""
    k1, k2, k3, k4 = jax.random.split(key, 4)
    lim1 = 1.0 / jnp.sqrt(latent_dim)
    lim2 = 1.0 / jnp.sqrt(hidden_dim)
    w1 = jax.random.uniform(k1, (latent_dim, hidden_dim), jnp.float32, -lim1, lim1)
    b1 = jax.random.uniform(k2, (1, hidden_dim), jnp.float32, -lim1, lim1)
    w2 = jax.random.uniform(k3, (hidden_dim, latent_dim), jnp.float32, -lim2, lim2)
    b2 = jax.random.uniform(k4, (1, latent_dim), jnp.float32, -lim2, lim2)
    return w1, b1, w2, b2


def _reference(z, params, backwards, compute_dtype=jnp.bfloat16,
               elementwise_dtype=jnp.float32):
    """Pure-JAX reference with the same mixed-precision recipe as the kernel."""
    w1, b1, w2, b2 = params
    B, N, D = z.shape
    zc = z.reshape(-1, D).astype(compute_dtype)
    h = jnp.dot(zc, w1.astype(compute_dtype), preferred_element_type=jnp.float32)
    h = jnp.tanh(h.astype(elementwise_dtype)
                 + b1.reshape(1, -1).astype(elementwise_dtype))
    g = jnp.dot(h.astype(compute_dtype), w2.astype(compute_dtype),
                preferred_element_type=jnp.float32)
    g = (g + b2.reshape(1, -1).astype(jnp.float32)).reshape(B, N, D)
    return (g if backwards else -g).astype(z.dtype)


if __name__ == "__main__":
    key = jax.random.PRNGKey(0)
    k_z, k_p, k_z2 = jax.random.split(key, 3)

    batch, n_nodes, latent, hidden = 2, 4, 32, 64
    z = jax.random.normal(k_z, (batch, n_nodes, latent), jnp.float32)
    params = init_ode_func_net_params(k_p, latent, hidden)
    t_local = jnp.float32(0.1)  # unused by the reference forward
    ew_dtype = _pick_elementwise_dtype(jnp.bfloat16)

    # forward (backwards=False) == -net(z)
    out = jax.block_until_ready(
        reverse_graph_ode_func(z, params, t_local=t_local, backwards=False))
    ref = _reference(z, params, backwards=False, elementwise_dtype=ew_dtype)
    assert out.shape == z.shape
    assert jnp.allclose(out, ref, atol=2e-2, rtol=2e-2), \
        float(jnp.max(jnp.abs(out - ref)))

    # Sanity vs. full-f32 math (bf16 quantization bounds the difference).
    w1, b1, w2, b2 = params
    ref32 = -(jnp.tanh(z.reshape(-1, latent) @ w1 + b1) @ w2 + b2).reshape(z.shape)
    assert jnp.allclose(out, ref32, atol=0.15, rtol=0.15)

    # backwards=True path == +net(z)
    out_bwd = jax.block_until_ready(
        reverse_graph_ode_func(z, params, t_local=t_local, backwards=True))
    ref_bwd = _reference(z, params, backwards=True, elementwise_dtype=ew_dtype)
    assert jnp.allclose(out_bwd, ref_bwd, atol=2e-2, rtol=2e-2)

    # Larger, ragged row count: exercises multi-tile grid + ragged-last-block path.
    z_big = jax.random.normal(k_z2, (3, 701, latent), jnp.float32)
    out_big = jax.block_until_ready(
        reverse_graph_ode_func(z_big, params, backwards=False))
    ref_big = _reference(z_big, params, backwards=False, elementwise_dtype=ew_dtype)
    assert out_big.shape == z_big.shape
    assert jnp.allclose(out_big, ref_big, atol=2e-2, rtol=2e-2)

    print("KERNEL_OK")
</pallas_src>

<mosaic_0001>
module attributes {stable_mosaic.version = 11 : i64} {
  func.func @_ode_func_kernel(%arg0: i32, %arg1: memref<8x128xf32, #tpu.memory_space<vmem>>, %arg2: memref<128x256xbf16, #tpu.memory_space<vmem>>, %arg3: memref<1x256xf32, #tpu.memory_space<vmem>>, %arg4: memref<256x128xbf16, #tpu.memory_space<vmem>>, %arg5: memref<1x128xf32, #tpu.memory_space<vmem>>, %arg6: memref<8x128xf32, #tpu.memory_space<vmem>>) attributes {dimension_semantics = [#tpu.dimension_semantics<parallel>], iteration_bounds = array<i64: 1>, scalar_prefetch = 0 : i64, scratch_operands = 0 : i64, tpu.core_type = #tpu.core_type<tc>, window_params = [{transform_indices = @transform_0, window_bounds = array<i64: 8, 128>}, {pipeline_mode = #tpu.pipeline_mode<synchronous>, transform_indices = @transform_1, window_bounds = array<i64: 128, 256>}, {pipeline_mode = #tpu.pipeline_mode<synchronous>, transform_indices = @transform_2, window_bounds = array<i64: 1, 256>}, {pipeline_mode = #tpu.pipeline_mode<synchronous>, transform_indices = @transform_3, window_bounds = array<i64: 256, 128>}, {pipeline_mode = #tpu.pipeline_mode<synchronous>, transform_indices = @transform_4, window_bounds = array<i64: 1, 128>}, {transform_indices = @transform_5, window_bounds = array<i64: 8, 128>}]} {
    %c0 = arith.constant 0 : index
    %c0_0 = arith.constant 0 : index
    %0 = vector.load %arg1[%c0, %c0_0] : memref<8x128xf32, #tpu.memory_space<vmem>>, vector<8x128xf32>
    %1 = arith.truncf %0 : vector<8x128xf32> to vector<8x128xbf16>
    %c0_1 = arith.constant 0 : index
    %c0_2 = arith.constant 0 : index
    %2 = vector.load %arg2[%c0_1, %c0_2] : memref<128x256xbf16, #tpu.memory_space<vmem>>, vector<128x256xbf16>
    %cst = arith.constant dense<0.000000e+00> : vector<8x256xf32>
    %3 = tpu.matmul %1, %2, %cst {dimension_numbers = #tpu.dot_dimension_numbers<[1], [0], [0], [1], [0, 0, 1, 1], [], []>} : vector<8x128xbf16>, vector<128x256xbf16>, vector<8x256xf32> -> vector<8x256xf32>
    %c0_3 = arith.constant 0 : index
    %c0_4 = arith.constant 0 : index
    %4 = vector.load %arg3[%c0_3, %c0_4] : memref<1x256xf32, #tpu.memory_space<vmem>>, vector<1x256xf32>
    %5 = vector.broadcast %4 : vector<1x256xf32> to vector<8x256xf32>
    %6 = arith.addf %3, %5 : vector<8x256xf32>
    %7 = math.tanh %6 : vector<8x256xf32>
    %8 = arith.truncf %7 : vector<8x256xf32> to vector<8x256xbf16>
    %c0_5 = arith.constant 0 : index
    %c0_6 = arith.constant 0 : index
    %9 = vector.load %arg4[%c0_5, %c0_6] : memref<256x128xbf16, #tpu.memory_space<vmem>>, vector<256x128xbf16>
    %cst_7 = arith.constant dense<0.000000e+00> : vector<8x128xf32>
    %10 = tpu.matmul %8, %9, %cst_7 {dimension_numbers = #tpu.dot_dimension_numbers<[1], [0], [0], [1], [0, 0, 1, 1], [], []>} : vector<8x256xbf16>, vector<256x128xbf16>, vector<8x128xf32> -> vector<8x128xf32>
    %c0_8 = arith.constant 0 : index
    %c0_9 = arith.constant 0 : index
    %11 = vector.load %arg5[%c0_8, %c0_9] : memref<1x128xf32, #tpu.memory_space<vmem>>, vector<1x128xf32>
    %12 = vector.broadcast %11 : vector<1x128xf32> to vector<8x128xf32>
    %13 = arith.addf %10, %12 : vector<8x128xf32>
    %cst_10 = arith.constant 0.000000e+00 : f32
    %14 = vector.broadcast %cst_10 : f32 to vector<8x128xf32>
    %15 = arith.subf %14, %13 : vector<8x128xf32>
    %c0_11 = arith.constant 0 : index
    %c0_12 = arith.constant 0 : index
    %16 = vector.load %arg6[%c0_11, %c0_12] : memref<8x128xf32, #tpu.memory_space<vmem>>, vector<8x128xf32>
    tpu.vector_store %arg6[%c0_11, %c0_12], %15 {strides = array<i32>} : memref<8x128xf32, #tpu.memory_space<vmem>>, vector<8x128xf32>,
    return
  }
  func.func @transform_0(%arg0: i32) -> (i32, i32) {
    %c0_i32 = arith.constant 0 : i32
    %c0_i32_0 = arith.constant 0 : i32
    return %arg0, %c0_i32 : i32, i32
  }
  func.func @transform_1(%arg0: i32) -> (i32, i32) {
    %c0_i32 = arith.constant 0 : i32
    %c0_i32_0 = arith.constant 0 : i32
    %c0_i32_1 = arith.constant 0 : i32
    return %c0_i32, %c0_i32_0 : i32, i32
  }
  func.func @transform_2(%arg0: i32) -> (i32, i32) {
    %c0_i32 = arith.constant 0 : i32
    %c0_i32_0 = arith.constant 0 : i32
    %c0_i32_1 = arith.constant 0 : i32
    return %c0_i32, %c0_i32_0 : i32, i32
  }
  func.func @transform_3(%arg0: i32) -> (i32, i32) {
    %c0_i32 = arith.constant 0 : i32
    %c0_i32_0 = arith.constant 0 : i32
    %c0_i32_1 = arith.constant 0 : i32
    return %c0_i32, %c0_i32_0 : i32, i32
  }
  func.func @transform_4(%arg0: i32) -> (i32, i32) {
    %c0_i32 = arith.constant 0 : i32
    %c0_i32_0 = arith.constant 0 : i32
    %c0_i32_1 = arith.constant 0 : i32
    return %c0_i32, %c0_i32_0 : i32, i32
  }
  func.func @transform_5(%arg0: i32) -> (i32, i32) {
    %c0_i32 = arith.constant 0 : i32
    %c0_i32_0 = arith.constant 0 : i32
    return %arg0, %c0_i32 : i32, i32
  }
}

</mosaic_0001>

<bundles_post_ra>
// kernel: tpu_custom_call.1
= control target key start
LH: loop header
LB: loop body
LE: loop exit
PB: predicated region body
PF: predicated region fallthrough
CT: control target
= control target key end

     0   :  { %10 = vsyncpa [#allocation3], 0  ;;  %s752_s0 = inlined_call_operand.hbm [shape: f32[8,128], index: 0, kind: input, shape index: {}]   ;;  %s753_s1 = inlined_call_operand.hbm [shape: bf16[128,256], index: 1, kind: input, shape index: {}]   ;;  %s754_s2 = inlined_call_operand.hbm [shape: f32[1,256], index: 2, kind: input, shape index: {}]   ;;  %s755_s3 = inlined_call_operand.hbm [shape: bf16[256,128], index: 3, kind: input, shape index: {}]   ;;  %s756_s4 = inlined_call_operand.vmem [shape: f32[1,128], index: 4, kind: input, shape index: {}]   ;;  %s757_s5 = inlined_call_operand.hbm [shape: f32[8,128], index: 5, kind: output, shape index: {}]  }
   0x1   :  { %11 = vsyncpa [#allocation6], 0 }
   0x2   :  { %12 = vsyncpa [#allocation9], 0  ;;  %s29_s20 = sshll.u32 %s753_s1, 4  ;;  %s30_s20 = int_to_ptr.hbm [resolvable:$true] %s29_s20 }
   0x3   :  { %13 = vsyncpa [#allocation4], 0  ;;  %s695_s21 = smov [#allocation5]   ;;  %s19_s25 = sshll.u32 %s752_s0, 4  ;;  %s20_s25 = int_to_ptr.hbm [resolvable:$true] %s19_s25 }
   0x4   :  { %s31_s22 = sshll.u32 %s695_s21, 4  ;;  %s696_s26 = smov 128   ;;  %s32_s22 = int_to_ptr.vmem [resolvable:$true] %s31_s22 }
   0x5   :  { %s697_s27 = smov 8   ;;  %s698_s28 = smov [#allocation2]  }
   0x6   :  { %37 = dma.hbm_to_vmem [thread:$0]  %s30_s20, 2048, %s32_s22, [#allocation6], %s696_s26, %s696_s26, %s697_s27  }
   0x7   :  { %s21_s29 = sshll.u32 %s698_s28, 4  ;;  %s43_s7 = sshll.u32 %s754_s2, 4  ;;  %s22_s29 = int_to_ptr.vmem [resolvable:$true] %s21_s29  ;;  %s44_s7 = int_to_ptr.hbm [resolvable:$true] %s43_s7 }
   0x8   :  { %24 = dma.hbm_to_vmem [thread:$0]  %s20_s25, 128, %s22_s29, [#allocation3]  }
   0x9   :  { %s53_s9 = sshll.u32 %s755_s3, 4  ;;  %s699_s10 = smov [#allocation7]   ;;  %s54_s9 = int_to_ptr.hbm [resolvable:$true] %s53_s9 }
   0xa   :  { %s45_s11 = sshll.u32 %s699_s10, 4  ;;  %s700_s0 = smov [#allocation8]   ;;  %s46_s11 = int_to_ptr.vmem [resolvable:$true] %s45_s11 }
   0xb   :  { %48 = dma.hbm_to_vmem [thread:$0]  %s44_s7, 32, %s46_s11, [#allocation6]  }
   0xc   :  { %s55_s12 = sshll.u32 %s700_s0, 4  ;;  %s701_s13 = smov 64   ;;  %s56_s12 = int_to_ptr.vmem [resolvable:$true] %s55_s12 }
   0xd   :  { %s702_s14 = smov 4  }
   0xe   :  { %61 = dma.hbm_to_vmem [thread:$0]  %s54_s9, 2048, %s56_s12, [#allocation9], %s701_s13, %s701_s13, %s702_s14  }
   0xf   :  { %687 = dma.done.wait [#allocation3], 128  }
  0x10   :  { %688 = vsyncadd [#allocation3], 4294967168 }
  0x11   :  { %689 = dma.done.wait [#allocation6], 2080  }
  0x12   :  { %690 = vsyncadd [#allocation6], 4294965216 }
  0x13   :  { %691 = dma.done.wait [#allocation9], 2048  }
  0x14   :  { %692 = vsyncadd [#allocation9], 4294965248  ;;  %v451_v0 = vld [vmem:[#allocation5 + $0x70] sm:$0xf]  ;;  %v536_v1 = vld [vmem:[#allocation5 + $0x74] sm:$0xf0] }
  0x15   :  { %v535_v2 = vld [vmem:[#allocation5 + $0x74] sm:$0xf]  ;;  %v452_v3 = vor.u32 %v536_v1, %v451_v0  ;;  %v453_v4 = vld [vmem:[#allocation5 + $0x78] sm:$0xf0]  ;;  %v443_v5 = vld [vmem:[#allocation5 + $0x60] sm:$0xf] }
  0x16   :  { %v534_v6 = vld [vmem:[#allocation5 + $0x64] sm:$0xf0]  ;;  %v456_v7 = vor.u32 %v535_v2, %v453_v4  ;;  %v533_v8 = vld [vmem:[#allocation5 + $0x64] sm:$0xf]  ;;  %v445_v9 = vld [vmem:[#allocation5 + $0x68] sm:$0xf0] }
  0x17   :  { %184 = vmatpush.bf16.msra.mxu0 %v452_v3  ;;  %v444_v10 = vor.u32 %v534_v6, %v443_v5  ;;  %v448_v11 = vor.u32 %v533_v8, %v445_v9  ;;  %v435_v12 = vld [vmem:[#allocation5 + $0x50] sm:$0xf]  ;;  %v532_v13 = vld [vmem:[#allocation5 + $0x54] sm:$0xf0]  ;;  %v531_v14 = vld [vmem:[#allocation5 + $0x54] sm:$0xf] }
  0x18   :  { %197 = vmatpush.bf16.msra.mxu1 %v456_v7  ;;  %v437_v15 = vld [vmem:[#allocation5 + $0x58] sm:$0xf0]  ;;  %v436_v16 = vor.u32 %v532_v13, %v435_v12  ;;  %v427_v18 = vld [vmem:[#allocation5 + $0x40] sm:$0xf]  ;;  %v530_v19 = vld [vmem:[#allocation5 + $0x44] sm:$0xf0] }
  0x19   :  { %v440_v17 = vor.u32 %v531_v14, %v437_v15  ;;  %v529_v20 = vld [vmem:[#allocation5 + $0x44] sm:$0xf]  ;;  %v429_v21 = vld [vmem:[#allocation5 + $0x48] sm:$0xf0]  ;;  %v428_v22 = vor.u32 %v530_v19, %v427_v18  ;;  %v544_v23 = vld [vmem:[#allocation8 + $0x38] sm:$0xff]  ;;  %s703_s15 = smov [#allocation10]  }
  0x1a   :  { %v552_v24 = vld [vmem:[#allocation8 + $0x78] sm:$0xff]  ;;  %v432_v25 = vor.u32 %v529_v20, %v429_v21  ;;  %v419_v26 = vld [vmem:[#allocation5 + $0x30] sm:$0xf]  ;;  %v527_v28 = vld [vmem:[#allocation5 + $0x34] sm:$0xf]  ;;  %346 = vmatpush.bf16.msra.mxu2 %v544_v23  ;;  %s379_s16 = sshll.u32 %s703_s15, 4  ;;  %s380_s16 = int_to_ptr.vmem [resolvable:$true] %s379_s16 }
  0x1b   :  { %185 = vmatpush.bf16.msra.mxu0 %v444_v10  ;;  %v528_v27 = vld [vmem:[#allocation5 + $0x34] sm:$0xf0]  ;;  %v421_v29 = vld [vmem:[#allocation5 + $0x38] sm:$0xf0]  ;;  %359 = vmatpush.bf16.msra.mxu3 %v552_v24  ;;  %v411_v34 = vld [vmem:[#allocation5 + $0x20] sm:$0xf] }
  0x1c   :  { %198 = vmatpush.bf16.msra.mxu1 %v448_v11  ;;  %v543_v30 = vld [vmem:[#allocation8 + $0x30] sm:$0xff]  ;;  %v420_v32 = vor.u32 %v528_v27, %v419_v26  ;;  %v424_v33 = vor.u32 %v527_v28, %v421_v29  ;;  %v526_v35 = vld [vmem:[#allocation5 + $0x24] sm:$0xf0]  ;;  %v525_v36 = vld [vmem:[#allocation5 + $0x24] sm:$0xf]  ;;  %s381_s19 = sshll.u32 %s757_s5, 4  ;;  %s382_s19 = int_to_ptr.hbm [resolvable:$true] %s381_s19 }
  0x1d   :  { %v551_v31 = vld [vmem:[#allocation8 + $0x70] sm:$0xff]  ;;  %v413_v37 = vld [vmem:[#allocation5 + $0x28] sm:$0xf0]  ;;  %v412_v40 = vor.u32 %v526_v35, %v411_v34  ;;  %v405_v45 = vld [vmem:[#allocation5 + $0x18] sm:$0xf0] }
  0x1e   :  { %347 = vmatpush.bf16.msra.mxu2 %v543_v30  ;;  %v542_v38 = vld [vmem:[#allocation8 + $0x28] sm:$0xff]  ;;  %v416_v41 = vor.u32 %v525_v36, %v413_v37  ;;  %v524_v43 = vld [vmem:[#allocation5 + $0x14] sm:$0xf0]  ;;  %v523_v44 = vld [vmem:[#allocation5 + $0x14] sm:$0xf] }
  0x1f   :  { %186 = vmatpush.bf16.msra.mxu0 %v436_v16  ;;  %360 = vmatpush.bf16.msra.mxu3 %v551_v31  ;;  %v550_v39 = vld [vmem:[#allocation8 + $0x68] sm:$0xff]  ;;  %v541_v46 = vld [vmem:[#allocation8 + $0x20] sm:$0xff]  ;;  %v408_v49 = vor.u32 %v523_v44, %v405_v45  ;;  %v540_v54 = vld [vmem:[#allocation8 + $0x18] sm:$0xff] }
  0x20   :  { %199 = vmatpush.bf16.msra.mxu1 %v440_v17  ;;  %v403_v42 = vld [vmem:[#allocation5 + $0x10] sm:$0xf]  ;;  %v549_v47 = vld [vmem:[#allocation8 + $0x60] sm:$0xff]  ;;  %v397_v53 = vld [vmem:[#allocation5 + $0x8] sm:$0xf0] }
  0x21   :  { %v404_v48 = vor.u32 %v524_v43, %v403_v42  ;;  %v395_v50 = vld [vmem:[#allocation5] sm:$0xf]  ;;  %v522_v51 = vld [vmem:[#allocation5 + $0x4] sm:$0xf0]  ;;  %v521_v52 = vld [vmem:[#allocation5 + $0x4] sm:$0xf] }
  0x22   :  { %348 = vmatpush.bf16.msra.mxu2 %v542_v38  ;;  %v548_v55 = vld [vmem:[#allocation8 + $0x58] sm:$0xff]  ;;  %v396_v56 = vor.u32 %v522_v51, %v395_v50  ;;  %v400_v58 = vor.u32 %v521_v52, %v397_v53  ;;  %v539_v60 = vld [vmem:[#allocation8 + $0x10] sm:$0xff]  ;;  %v538_v62 = vld [vmem:[#allocation8 + $0x8] sm:$0xff] }
  0x23   :  { %187 = vmatpush.bf16.msra.mxu0 %v428_v22  ;;  %361 = vmatpush.bf16.msra.mxu3 %v550_v39  ;;  %v80_v57 = vld [vmem:[#allocation2] sm:$0xff]  ;;  %v546_v63 = vld [vmem:[#allocation8 + $0x48] sm:$0xff]  ;;  %v537_v0 = vld [vmem:[#allocation8] sm:$0xff] }
  0x24   :  { %200 = vmatpush.bf16.msra.mxu1 %v432_v25  ;;  %v81_v59 = vpack.c.bf16 %v80_v57, %v80_v57  ;;  %v547_v61 = vld [vmem:[#allocation8 + $0x50] sm:$0xff]  ;;  %v545_v1 = vld [vmem:[#allocation8 + $0x40] sm:$0xff]  ;;  %v98_v2 = vld [vmem:[#allocation7] sm:$0x3] }
  0x25   :  { %v100_v3 = vperm.slane %v98_v2, 0  ;;  %v101_v4 = vperm.slane %v98_v2, 1  ;;  %v562_v15 = vld [vmem:[%s756_s4] ss:$0 sm:$0xff] }
  0x26   :  { %349 = vmatpush.bf16.msra.mxu2 %v541_v46 }
  0x27   :  { %188 = vmatpush.bf16.msra.mxu0 %v420_v32  ;;  %362 = vmatpush.bf16.msra.mxu3 %v549_v47 }
  0x28   :  { %201 = vmatpush.bf16.msra.mxu1 %v424_v33 }
  0x2a   :  { %350 = vmatpush.bf16.msra.mxu2 %v540_v54 }
  0x2b   :  { %189 = vmatpush.bf16.msra.mxu0 %v412_v40  ;;  %363 = vmatpush.bf16.msra.mxu3 %v548_v55 }
  0x2c   :  { %202 = vmatpush.bf16.msra.mxu1 %v416_v41 }
  0x2e   :  { %351 = vmatpush.bf16.msra.mxu2 %v539_v60 }
  0x2f   :  { %190 = vmatpush.bf16.msra.mxu0 %v404_v48  ;;  %364 = vmatpush.bf16.msra.mxu3 %v547_v61 }
  0x30   :  { %203 = vmatpush.bf16.msra.mxu1 %v408_v49 }
  0x32   :  { %352 = vmatpush.bf16.msra.mxu2 %v538_v62 }
  0x33   :  { %191 = vmatpush.bf16.msra.mxu0 %v396_v56  ;;  %365 = vmatpush.bf16.msra.mxu3 %v546_v63 }
  0x34   :  { %204 = vmatpush.bf16.msra.mxu1 %v400_v58 }
  0x36   :  { %192 = vmatmul.bf16.vlgmr.msra.gmra.mxu0 %v81_v59  ;;  %353 = vmatpush.bf16.msra.mxu2 %v537_v0 }
  0x37   :  { %205 = vmatmul.bf16.vlgmr.msra.gmra.mxu1 %v81_v59  ;;  %366 = vmatpush.bf16.msra.mxu3 %v545_v1 }
  0xb3   :  { %v193_v5 = vpop.f32.mrf.mxu0 }
  0xb4   :  { %v194_v6 = vadd.f32 %v193_v5, %v100_v3  ;;  %v206_v7 = vpop.f32.mrf.mxu1 }
  0xb5   :  { %v207_v8 = vadd.f32 %v206_v7, %v101_v4 }
  0xb6   :  { %563 = vtanh.f32 %v194_v6 }
  0xb7   :  { %565 = vtanh.f32 %v207_v8 }
  0xbb   :  { %v195_v9 = vpop.f32.mrf.mxu0 }
  0xbc   :  { %v564_v10 = vpop.eup %563  ;;  %v208_v11 = vpop.f32.mrf.mxu1 }
  0xbd   :  { %v566_v12 = vpop.eup %565  ;;  %v212_v13 = vpack.c.bf16 %v564_v10, %v564_v10 }
  0xbe   :  { %v213_v14 = vpack.c.bf16 %v566_v12, %v566_v12 }
  0xbf   :  { %354 = vmatmul.bf16.vlgmr.msra.gmra.mxu2 %v212_v13 }
  0xc0   :  { %367 = vmatmul.bf16.vlgmr.msra.gmra.mxu3 %v213_v14 }
 0x142   :  { %v355_v16 = vpop.f32.mrf.mxu2 }
 0x143   :  { %v356_v17 = vadd.f32 %v562_v15, %v355_v16  ;;  %v368_v18 = vpop.f32.mrf.mxu3 }
 0x145   :  { %v369_v19 = vadd.f32 %v368_v18, %v356_v17 }
 0x147   :  { %v372_v20 = vsub.f32 0.0, %v369_v19 }
 0x149   :  { %373 = vst [vmem:[#allocation10] sm:$0xff] %v372_v20 }
 0x14a   :  { %v357_v21 = vpop.f32.mrf.mxu2  ;;  %384 = dma.vmem_to_hbm [thread:$0]  %s380_s16, 128, %s382_s19, [#allocation4]  }
 0x14b   :  { %v370_v22 = vpop.f32.mrf.mxu3 }
 0x14c   :  { %693 = dma.done.wait [#allocation4], 128  }
 0x14d   :  { %694 = vsyncadd [#allocation4], 4294967168 }
 0x14e   :  { %389 = vsyncpa [#allocation3], 1 }
 0x14f   :  { %390 = vsyncpa [#allocation6], 1 }
 0x150   :  { %391 = vsyncpa [#allocation9], 1 }
 0x151   :  { %392 = vsyncpa [#allocation4], 1 }

</bundles_post_ra>
